<compile_context>
chip_gen: v7x
topology: tpu7x:2x2x1
jax: 0.10.0
libtpu: 0.0.40
codegen_flags: <defaults>
</compile_context>

<pallas_src>
import functools

import jax
import jax.numpy as jnp
from jax.experimental import pallas as pl
from jax.experimental.pallas import tpu as pltpu


def _round_up(x, m):
    return ((x + m - 1) // m) * m


def _cdiv(a, b):
    return (a + b - 1) // b


def _vmem_capacity_bytes():
    try:
        return int(pltpu.get_tpu_info().vmem_capacity_bytes)
    except Exception:
        return 64 * 2**20          # conservative fallback (v7x per-TensorCore)


def _vmem_estimate_bytes(tile_l, c_in, c_out, k, itemsize=4):
    # Double-buffered streamed blocks (input chunk + halo + output tile).
    stream = 2 * (c_in * tile_l + c_in * 128 + c_out * tile_l)
    # Weight blocks (constant index; assume 2 buffers to stay conservative).
    weights = 2 * (k * c_out * c_in + c_out + 2 * c_out * c_out)
    # In-kernel temporaries: stacked taps + intermediate activations.
    scratch = k * c_in * tile_l + 2 * c_out * tile_l
    return itemsize * (stream + weights + scratch)


def _pick_tile_l(l_out, n, c_in, c_out, k, tile_l=None):
    cap = _vmem_capacity_bytes()
    budget = cap // 2
    # 2048-lane tiles on 128 MiB-VMEM chips (v5e/v6e), 1024 on v7x (64 MiB/TC).
    max_tl = 2048 if cap >= 96 * 2**20 else 1024
    if tile_l is not None:
        max_tl = max(int(tile_l), 128)
    tl = min(_round_up(max_tl, 128), _round_up(max(l_out, 1), 128))
    while tl > 128 and _vmem_estimate_bytes(tl, c_in, c_out, k) > budget:
        tl -= 128
    # v7x megacore: guarantee >= 2 parallel grid cells when N == 1.
    if n == 1 and l_out > 128 and _cdiv(l_out, tl) < 2:
        tl = _round_up(_cdiv(l_out, 2), 128)
    return tl


def _mlp(xs, w1, b1, w2, w3, out_dtype):
    """relu(w1 @ xs + b1) -> relu(w2 @ .) -> relu(w3 @ .).  xs: (K*C_in, TILE_L)."""
    cdt = w1.dtype
    h = jnp.dot(w1, xs, preferred_element_type=jnp.float32) + b1
    h = jnp.maximum(h, 0.0)
    h = jnp.maximum(jnp.dot(w2, h.astype(cdt), preferred_element_type=jnp.float32), 0.0)
    h = jnp.maximum(jnp.dot(w3, h.astype(cdt), preferred_element_type=jnp.float32), 0.0)
    return h.astype(out_dtype)


def _make_stride1_kernel(dilation, kernel_size):
    def kernel(xa_ref, xh_ref, w1_ref, b1_ref, w2_ref, w3_ref, o_ref):
        # xa_ref: (C_in, TILE_L)  main chunk of the (minimally) padded input
        # xh_ref: (C_in, 128)     halo = first 128 lanes of the next chunk
        # w1_ref: (C_out, K*C_in) tap-stacked dilated-conv weights
        # b1_ref: (C_out, 1)
        # w2_ref, w3_ref: (C_out, C_out) pointwise conv weights
        # o_ref:  (C_out, TILE_L) lane-dense output tile (already NCL layout)
        xa = xa_ref[...]
        xh = xh_ref[...]
        taps = []
        for k in range(kernel_size):
            off = k * dilation
            if off == 0:
                taps.append(xa)
            else:
                # Only stitch the `off` halo lanes; no full-width window copy.
                taps.append(jnp.concatenate([xa[:, off:], xh[:, :off]], axis=-1))
        xs = taps[0] if kernel_size == 1 else jnp.concatenate(taps, axis=0)
        o_ref[...] = _mlp(xs, w1_ref[...], b1_ref[...], w2_ref[...], w3_ref[...],
                          o_ref.dtype)
    return kernel


def _prestacked_kernel(xs_ref, w1_ref, b1_ref, w2_ref, w3_ref, o_ref):
    # xs_ref: (K*C_in, TILE_L) taps already stacked by the wrapper (stride > 1).
    o_ref[...] = _mlp(xs_ref[...], w1_ref[...], b1_ref[...], w2_ref[...],
                      w3_ref[...], o_ref.dtype)


@functools.partial(
    jax.jit,
    static_argnames=("kernel_size", "stride", "padding", "dilation", "tile_l",
                     "compute_dtype"))
def nin_forward(x, w1, b1, w2, w3, *, kernel_size, stride, padding,
                dilation=2, tile_l=None, compute_dtype=jnp.float32):
    """Fused NIN forward.  x: (N, C_in, L) -> (N, C_out, L_out)."""
    N, C_in, L = x.shape
    C_out = w1.shape[0]
    K = kernel_size
    halo = (K - 1) * dilation
    L_out = (L + 2 * padding - dilation * (K - 1) - 1) // stride + 1
    assert L_out > 0, "output length must be positive"
    assert halo < 128, "kernel footprint must fit within the 128-lane halo"

    tl = _pick_tile_l(L_out, N, C_in, C_out, K, tile_l)
    n_tiles = _cdiv(L_out, tl)

    # Weight layouts for channels-by-positions matmuls.
    w1_s = jnp.transpose(w1, (0, 2, 1)).reshape(C_out, K * C_in).astype(compute_dtype)
    b1_arr = b1 if b1 is not None else jnp.zeros((C_out,), jnp.float32)
    b1_r = b1_arr.reshape(C_out, 1).astype(jnp.float32)
    w2_m = w2.reshape(C_out, C_out).astype(compute_dtype)
    w3_m = w3.reshape(C_out, C_out).astype(compute_dtype)

    # TODO(synk): weights are tiny here; for large C_out consider
    # pipeline_mode=pl.Buffered(1) on these constant-index blocks.
    weight_specs = [
        pl.BlockSpec((C_out, K * C_in), lambda n, j: (0, 0)),
        pl.BlockSpec((C_out, 1), lambda n, j: (0, 0)),
        pl.BlockSpec((C_out, C_out), lambda n, j: (0, 0)),
        pl.BlockSpec((C_out, C_out), lambda n, j: (0, 0)),
    ]
    # Output is written straight into (N, C_out, L_out): the final partial
    # block is masked, so there is no post-kernel slice / extra HBM pass.
    out_spec = pl.BlockSpec((None, C_out, tl), lambda n, j: (n, 0, j))
    out_shape = jax.ShapeDtypeStruct((N, C_out, L_out), jnp.float32)

    cap = _vmem_capacity_bytes()
    vmem_limit = int(min(max(2 * _vmem_estimate_bytes(tl, C_in, C_out, K),
                             16 * 2**20),
                         int(0.7 * cap)))
    cparams = pltpu.CompilerParams(
        dimension_semantics=("parallel", "parallel"),
        vmem_limit_bytes=vmem_limit)

    if stride == 1:
        # Fast path: read x directly in NCL layout, one (C_in, tl) chunk plus a
        # 128-lane halo per grid step; taps are built in-register in the kernel.
        L_pad = n_tiles * tl + 128
        left, right = padding, L_pad - L - padding
        assert right >= 0
        x_in = x if x.dtype == compute_dtype else x.astype(compute_dtype)
        if left or right:
            x_in = jnp.pad(x_in, ((0, 0), (0, 0), (left, right)))
        halo_mult = tl // 128
        kernel = _make_stride1_kernel(dilation, K)
        in_specs = [
            pl.BlockSpec((None, C_in, tl), lambda n, j: (n, 0, j)),
            pl.BlockSpec((None, C_in, 128),
                         lambda n, j: (n, 0, (j + 1) * halo_mult)),
        ] + weight_specs
        operands = (x_in, x_in, w1_s, b1_r, w2_m, w3_m)
    else:
        # stride > 1: lane-strided selects don't lower efficiently in Mosaic,
        # so gather the dilated/strided taps once in the wrapper (XLA strided
        # slices) and feed the kernel a tap-stacked (N, K*C_in, L_out) tensor.
        # TODO(synk): costs K extra input reads in HBM; a sublane-packed
        # strided-DMA layout could avoid this if stride > 1 ever matters.
        x_p = jnp.pad(x, ((0, 0), (0, 0), (padding, padding))).astype(compute_dtype)
        taps = [
            jax.lax.slice(x_p, (0, 0, k * dilation),
                          (N, C_in, k * dilation + (L_out - 1) * stride + 1),
                          (1, 1, stride))
            for k in range(K)
        ]
        xs = jnp.concatenate(taps, axis=1)                  # (N, K*C_in, L_out)
        xs = jnp.pad(xs, ((0, 0), (0, 0), (0, n_tiles * tl - L_out)))
        kernel = _prestacked_kernel
        in_specs = [pl.BlockSpec((None, K * C_in, tl), lambda n, j: (n, 0, j))
                    ] + weight_specs
        operands = (xs, w1_s, b1_r, w2_m, w3_m)

    return pl.pallas_call(
        kernel,
        out_shape=out_shape,
        grid_spec=pltpu.PrefetchScalarGridSpec(
            num_scalar_prefetch=0,
            grid=(N, n_tiles),
            in_specs=in_specs,
            out_specs=out_spec),
        compiler_params=cparams,
    )(*operands)


def _reference(x, w1, b1, w2, w3, *, stride, padding, dilation=2):
    """Pure-JAX reference matching PyTorch Conv1d semantics."""
    dn = jax.lax.conv_dimension_numbers(x.shape, w1.shape, ("NCH", "OIH", "NCH"))
    h = jax.lax.conv_general_dilated(
        x, w1, window_strides=(stride,), padding=[(padding, padding)],
        rhs_dilation=(dilation,), dimension_numbers=dn)
    b = b1 if b1 is not None else jnp.zeros((w1.shape[0],), x.dtype)
    h = jax.nn.relu(h + b.reshape(1, -1, 1))
    h = jax.nn.relu(jnp.einsum("oc,ncl->nol", w2[:, :, 0], h))
    h = jax.nn.relu(jnp.einsum("oc,ncl->nol", w3[:, :, 0], h))
    return h


if __name__ == "__main__":
    key = jax.random.PRNGKey(0)
    kx, k1, kb, k2, k3, kx2 = jax.random.split(key, 6)

    # Module-consistent small shapes (dilation is fixed to 2 by the module).
    N, C_in, L = 2, 4, 16
    C_out, K, stride, padding = 8, 3, 1, 2

    x = jax.random.normal(kx, (N, C_in, L), dtype=jnp.float32)
    bound1 = 1.0 / (C_in * K) ** 0.5
    w1 = jax.random.uniform(k1, (C_out, C_in, K), minval=-bound1, maxval=bound1,
                            dtype=jnp.float32)
    b1 = jax.random.uniform(kb, (C_out,), minval=-bound1, maxval=bound1,
                            dtype=jnp.float32)
    bound2 = 1.0 / C_out ** 0.5
    w2 = jax.random.uniform(k2, (C_out, C_out, 1), minval=-bound2, maxval=bound2,
                            dtype=jnp.float32)
    w3 = jax.random.uniform(k3, (C_out, C_out, 1), minval=-bound2, maxval=bound2,
                            dtype=jnp.float32)

    # --- Test 1: module-sized single-tile case. ---
    y = nin_forward(x, w1, b1, w2, w3, kernel_size=K, stride=stride,
                    padding=padding)
    y = jax.block_until_ready(y)
    y_ref = _reference(x, w1, b1, w2, w3, stride=stride, padding=padding)
    assert y.shape == y_ref.shape, (y.shape, y_ref.shape)
    assert jnp.allclose(y, y_ref, atol=1e-5, rtol=1e-5)

    # --- Test 2: multi-tile path (halo stitching + partial last output block). ---
    L2 = 300
    x2 = jax.random.normal(kx2, (1, C_in, L2), dtype=jnp.float32)
    y2 = nin_forward(x2, w1, b1, w2, w3, kernel_size=K, stride=stride,
                     padding=padding, tile_l=128)
    y2 = jax.block_until_ready(y2)
    y2_ref = _reference(x2, w1, b1, w2, w3, stride=stride, padding=padding)
    assert y2.shape == y2_ref.shape, (y2.shape, y2_ref.shape)
    assert jnp.allclose(y2, y2_ref, atol=1e-5, rtol=1e-5)

    print("KERNEL_OK")
</pallas_src>

<mosaic_0001>
module attributes {stable_mosaic.version = 11 : i64} {
  func.func @kernel(%arg0: i32, %arg1: i32, %arg2: memref<1x4x128xf32, #tpu.memory_space<vmem>>, %arg3: memref<1x4x128xf32, #tpu.memory_space<vmem>>, %arg4: memref<8x12xf32, #tpu.memory_space<vmem>>, %arg5: memref<8x1xf32, #tpu.memory_space<vmem>>, %arg6: memref<8x8xf32, #tpu.memory_space<vmem>>, %arg7: memref<8x8xf32, #tpu.memory_space<vmem>>, %arg8: memref<1x8x128xf32, #tpu.memory_space<vmem>>) attributes {dimension_semantics = [#tpu.dimension_semantics<parallel>, #tpu.dimension_semantics<parallel>], iteration_bounds = array<i64: 2, 1>, scalar_prefetch = 0 : i64, scratch_operands = 0 : i64, tpu.core_type = #tpu.core_type<tc>, window_params = [{transform_indices = @transform_0, window_bounds = array<i64: 1, 4, 128>}, {transform_indices = @transform_1, window_bounds = array<i64: 1, 4, 128>}, {pipeline_mode = #tpu.pipeline_mode<synchronous>, transform_indices = @transform_2, window_bounds = array<i64: 8, 12>}, {pipeline_mode = #tpu.pipeline_mode<synchronous>, transform_indices = @transform_3, window_bounds = array<i64: 8, 1>}, {pipeline_mode = #tpu.pipeline_mode<synchronous>, transform_indices = @transform_4, window_bounds = array<i64: 8, 8>}, {pipeline_mode = #tpu.pipeline_mode<synchronous>, transform_indices = @transform_5, window_bounds = array<i64: 8, 8>}, {transform_indices = @transform_6, window_bounds = array<i64: 1, 8, 128>}]} {
    %c0 = arith.constant 0 : index
    %c0_0 = arith.constant 0 : index
    %c0_1 = arith.constant 0 : index
    %0 = vector.load %arg2[%c0, %c0_0, %c0_1] : memref<1x4x128xf32, #tpu.memory_space<vmem>>, vector<1x4x128xf32>
    %1 = vector.shape_cast %0 : vector<1x4x128xf32> to vector<4x128xf32>
    %c0_2 = arith.constant 0 : index
    %c0_3 = arith.constant 0 : index
    %c0_4 = arith.constant 0 : index
    %2 = vector.load %arg3[%c0_2, %c0_3, %c0_4] : memref<1x4x128xf32, #tpu.memory_space<vmem>>, vector<1x4x128xf32>
    %3 = vector.shape_cast %2 : vector<1x4x128xf32> to vector<4x128xf32>
    %4 = vector.extract_strided_slice %1 {offsets = [0, 2], sizes = [4, 126], strides = [1, 1]} : vector<4x128xf32> to vector<4x126xf32>
    %5 = vector.extract_strided_slice %3 {offsets = [0, 0], sizes = [4, 2], strides = [1, 1]} : vector<4x128xf32> to vector<4x2xf32>
    %6 = tpu.concatenate %4, %5 in 1 : vector<4x126xf32>, vector<4x2xf32> -> vector<4x128xf32>
    %7 = vector.extract_strided_slice %1 {offsets = [0, 4], sizes = [4, 124], strides = [1, 1]} : vector<4x128xf32> to vector<4x124xf32>
    %8 = vector.extract_strided_slice %3 {offsets = [0, 0], sizes = [4, 4], strides = [1, 1]} : vector<4x128xf32> to vector<4x4xf32>
    %9 = tpu.concatenate %7, %8 in 1 : vector<4x124xf32>, vector<4x4xf32> -> vector<4x128xf32>
    %10 = tpu.concatenate %1, %6, %9 in 0 : vector<4x128xf32>, vector<4x128xf32>, vector<4x128xf32> -> vector<12x128xf32>
    %c0_5 = arith.constant 0 : index
    %c0_6 = arith.constant 0 : index
    %11 = vector.load %arg4[%c0_5, %c0_6] : memref<8x12xf32, #tpu.memory_space<vmem>>, vector<8x12xf32>
    %c0_7 = arith.constant 0 : index
    %c0_8 = arith.constant 0 : index
    %12 = vector.load %arg5[%c0_7, %c0_8] : memref<8x1xf32, #tpu.memory_space<vmem>>, vector<8x1xf32>
    %c0_9 = arith.constant 0 : index
    %c0_10 = arith.constant 0 : index
    %13 = vector.load %arg6[%c0_9, %c0_10] : memref<8x8xf32, #tpu.memory_space<vmem>>, vector<8x8xf32>
    %c0_11 = arith.constant 0 : index
    %c0_12 = arith.constant 0 : index
    %14 = vector.load %arg7[%c0_11, %c0_12] : memref<8x8xf32, #tpu.memory_space<vmem>>, vector<8x8xf32>
    %cst = arith.constant dense<0.000000e+00> : vector<8x128xf32>
    %15 = tpu.matmul %11, %10, %cst {dimension_numbers = #tpu.dot_dimension_numbers<[1], [0], [0], [1], [0, 0, 1, 1], [], []>} : vector<8x12xf32>, vector<12x128xf32>, vector<8x128xf32> -> vector<8x128xf32>
    %16 = vector.broadcast %12 : vector<8x1xf32> to vector<8x128xf32>
    %17 = arith.addf %15, %16 : vector<8x128xf32>
    %cst_13 = arith.constant 0.000000e+00 : f32
    %18 = vector.broadcast %cst_13 : f32 to vector<8x128xf32>
    %19 = arith.maximumf %17, %18 : vector<8x128xf32>
    %cst_14 = arith.constant dense<0.000000e+00> : vector<8x128xf32>
    %20 = tpu.matmul %13, %19, %cst_14 {dimension_numbers = #tpu.dot_dimension_numbers<[1], [0], [0], [1], [0, 0, 1, 1], [], []>} : vector<8x8xf32>, vector<8x128xf32>, vector<8x128xf32> -> vector<8x128xf32>
    %cst_15 = arith.constant 0.000000e+00 : f32
    %21 = vector.broadcast %cst_15 : f32 to vector<8x128xf32>
    %22 = arith.maximumf %20, %21 : vector<8x128xf32>
    %cst_16 = arith.constant dense<0.000000e+00> : vector<8x128xf32>
    %23 = tpu.matmul %14, %22, %cst_16 {dimension_numbers = #tpu.dot_dimension_numbers<[1], [0], [0], [1], [0, 0, 1, 1], [], []>} : vector<8x8xf32>, vector<8x128xf32>, vector<8x128xf32> -> vector<8x128xf32>
    %cst_17 = arith.constant 0.000000e+00 : f32
    %24 = vector.broadcast %cst_17 : f32 to vector<8x128xf32>
    %25 = arith.maximumf %23, %24 : vector<8x128xf32>
    %c0_18 = arith.constant 0 : index
    %c0_19 = arith.constant 0 : index
    %c0_20 = arith.constant 0 : index
    %26 = vector.load %arg8[%c0_18, %c0_19, %c0_20] : memref<1x8x128xf32, #tpu.memory_space<vmem>>, vector<1x8x128xf32>
    %27 = vector.shape_cast %26 : vector<1x8x128xf32> to vector<8x128xf32>
    %28 = vector.shape_cast %25 : vector<8x128xf32> to vector<1x8x128xf32>
    tpu.vector_store %arg8[%c0_18, %c0_19, %c0_20], %28 {strides = array<i32>} : memref<1x8x128xf32, #tpu.memory_space<vmem>>, vector<1x8x128xf32>,
    return
  }
  func.func @transform_0(%arg0: i32, %arg1: i32) -> (i32, i32, i32) {
    %c0_i32 = arith.constant 0 : i32
    %c0_i32_0 = arith.constant 0 : i32
    return %arg0, %c0_i32, %arg1 : i32, i32, i32
  }
  func.func @transform_1(%arg0: i32, %arg1: i32) -> (i32, i32, i32) {
    %c1_i32 = arith.constant 1 : i32
    %0 = arith.addi %arg1, %c1_i32 : i32
    %c1_i32_0 = arith.constant 1 : i32
    %1 = arith.muli %0, %c1_i32_0 : i32
    %c0_i32 = arith.constant 0 : i32
    %c0_i32_1 = arith.constant 0 : i32
    return %arg0, %c0_i32, %1 : i32, i32, i32
  }
  func.func @transform_2(%arg0: i32, %arg1: i32) -> (i32, i32) {
    %c0_i32 = arith.constant 0 : i32
    %c0_i32_0 = arith.constant 0 : i32
    %c0_i32_1 = arith.constant 0 : i32
    return %c0_i32, %c0_i32_0 : i32, i32
  }
  func.func @transform_3(%arg0: i32, %arg1: i32) -> (i32, i32) {
    %c0_i32 = arith.constant 0 : i32
    %c0_i32_0 = arith.constant 0 : i32
    %c0_i32_1 = arith.constant 0 : i32
    return %c0_i32, %c0_i32_0 : i32, i32
  }
  func.func @transform_4(%arg0: i32, %arg1: i32) -> (i32, i32) {
    %c0_i32 = arith.constant 0 : i32
    %c0_i32_0 = arith.constant 0 : i32
    %c0_i32_1 = arith.constant 0 : i32
    return %c0_i32, %c0_i32_0 : i32, i32
  }
  func.func @transform_5(%arg0: i32, %arg1: i32) -> (i32, i32) {
    %c0_i32 = arith.constant 0 : i32
    %c0_i32_0 = arith.constant 0 : i32
    %c0_i32_1 = arith.constant 0 : i32
    return %c0_i32, %c0_i32_0 : i32, i32
  }
  func.func @transform_6(%arg0: i32, %arg1: i32) -> (i32, i32, i32) {
    %c0_i32 = arith.constant 0 : i32
    %c0_i32_0 = arith.constant 0 : i32
    return %arg0, %c0_i32, %arg1 : i32, i32, i32
  }
}

</mosaic_0001>

<bundles_post_ra>
// kernel: nin_forward.1
= control target key start
LH: loop header
LB: loop body
LE: loop exit
PB: predicated region body
PF: predicated region fallthrough
CT: control target
= control target key end

     0   :  { %11 = vsyncpa [#allocation3], 0  ;;  %s1059_s0 = inlined_call_operand.vmem [shape: f32[2,4,256], index: 0, kind: input, shape index: {}, may-alias: {0,1}]   ;;  %s1060_s1 = inlined_call_operand.vmem [shape: f32[2,4,256], index: 1, kind: input, shape index: {}, may-alias: {0,1}]   ;;  %s1061_s2 = inlined_call_operand.vmem [shape: f32[8,12], index: 2, kind: input, shape index: {}]   ;;  %s1062_s3 = inlined_call_operand.vmem [shape: f32[8,1], index: 3, kind: input, shape index: {}]   ;;  %s1063_s4 = inlined_call_operand.vmem [shape: f32[8,8], index: 4, kind: input, shape index: {}]   ;;  %s1064_s5 = inlined_call_operand.vmem [shape: f32[8,8], index: 5, kind: input, shape index: {}]   ;;  %s1065_s6 = inlined_call_operand.hbm [shape: f32[2,8,16], index: 6, kind: output, shape index: {}]  }
   0x1   :  { %13 = vsyncpa [#allocation3 + $0x1], 0  ;;  %s929_s21 = smov 0   ;;  %s931_s22 = smov 0  }
   0x2   :  { %s933_s23 = smov 0   ;;  %s935_s24 = smov 0  }
   0x3   :  { %s937_s25 = smov 0   ;;  %s939_s26 = smov 0  }
   0x4 LB: > { %s682_s27 = sadd.s32 4294967295, %s884_s26   ;;  %s683_s28 = sadd.s32 4294967294, %s884_s26   ;;  %s884_s26 = sphi %s939_s26, %s19_s26   ;;  %s880_s25 = sphi %s937_s25, %s1072_s25   ;;  %s876_s24 = sphi %s935_s24, %s1071_s24   ;;  %s872_s23 = sphi %s933_s23, %s1070_s23   ;;  %s868_s22 = sphi %s931_s22, %s1069_s22   ;;  %s864_s21 = sphi %s929_s21, %s1068_s21  }
   0x5   : > { %s31_s29 = sadd.s32 1, %s880_s25  ;;  %s182_s30 = sadd.s32 1, %s872_s23 }
   0x6   : > { %p33_p0 = scmp.ge.s32.totalorder %s31_s29, 2  ;;  %p192_p1 = scmp.ne.s32.totalorder %s872_s23, %s868_s22 }
   0x7   : > { %p193_p2 = scmp.eq.s32.totalorder %s682_s27, 1  ;;  %p198_p3 = scmp.ne.s32.totalorder %s868_s22, %s864_s21 }
   0x8   : > { %s1074_s29 = smov (%p33_p0, %s31_s29), 0  ;;  %p199_p5 = scmp.eq.s32.totalorder %s683_s28, 1 }
   0x9   : > { %p969_p4 = por %p193_p2, %p192_p1  ;;  %s177_s8 = ssub.s32 %s880_s25, %s1074_s29 }
   0xa   : > { %p686_p6 = scmp.ge.s32.totalorder %s884_s26, 1  ;;  %p180_p7 = scmp.eq.s32.totalorder %s177_s8, 0 }
   0xb   : > { %p976_p8 = por %p199_p5, %p198_p3  ;;  %p253_p9 = scmp.lt.s32.totalorder %s884_s26, 3 }
   0xc   : > { %s982_s10 = scalar_select %p180_p7, %s872_s23, %s182_s30  }
   0xd   : > { %p254_p10 = pnand %p686_p6, %p253_p9 }
   0xe   : > { %p295_p11 = scmp.lt.s32.totalorder (!%p254_p10), %s876_s24, 1  ;;  %v886_v0 = vmov (!%p254_p10), 0.0|0.0   ;;  %vm887_vm0 = vmmov (!%p254_p10), 0   ;;  %v888_v3 = vmov (!%p254_p10), 0.0   ;;  %v339_v5 = vld [vmem:[%s1062_s3] sm:$0xff] (!%p254_p10)  ;;  %s889_s28 = smov (!%p254_p10), 126  }
   0xf   : > { %257 = sbr.rel (%p254_p10) target bundleno = 817 (0x331), region = 44  ;;  %728 = vmatprep.subr.bf16.mxu0 (!%p254_p10), %v886_v0  ;;  %715 = vmatprep.mubr.msk.f32.mxu0 (!%p254_p10), %vm887_vm0, %v888_v3  ;;  %v890_v6 = vmov (!%p254_p10), 0   ;;  %s891_s30 = smov (!%p254_p10), 124   ;;  %vm323_vm1 = vcmask (!%p254_p10), 1031168   ;;  %vm336_vm2 = vcmask (!%p254_p10), 1043456   ;;  %vm331_vm3 = vcmask (!%p254_p10), 1014784  }
  0x10   : > { %718 = vmatprep.subr.mxu1 (!%p254_p10), %v888_v3  ;;  %720 = vmatprep.mubr.msk.f32.mxu1 (!%p254_p10), %vm887_vm0, %v888_v3  ;;  %vm892_vm4 = vmmov (!%p254_p10), 1   ;;  %v338_v18 = vld [vmem:[%s1061_s2] sm:$0xff] (!%p254_p10)  ;;  %vm347_vm6 = vcmask (!%p254_p10), 97280   ;;  %vm425_vm7 = vcmask (!%p254_p10), 64512   ;;  %s697_s18 = sshll.u32 (!%p254_p10), %s876_s24, 7 }
  0x11   : > { %804 = vset.pattern.permute.xlu1 (!%p254_p10), %v890_v6  ;;  %805 = vset.pattern.permute.xlu0 (!%p254_p10), %v890_v6  ;;  %vm730_vm5 = vmpackc.low (!%p254_p10), %vm336_vm2, %vm892_vm4  ;;  %v340_v24 = vld [vmem:[%s1063_s4] sm:$0xff] (!%p254_p10) }
  0x12   : > { %344 = vperm.xlu1 (!%p254_p10), %804, %v339_v5   ;;  %v341_v28 = vld [vmem:[%s1064_s5] sm:$0xff] (!%p254_p10) }
  0x16   : > { %s296_s11 = scalar_select %p295_p11, %s876_s24, 1 }
  0x17   : > { %s893_s24 = smov [#allocation2]  }
  0x18   : > { %s700_s12 = sshll.u32 %s296_s11, 3 }
  0x19   : > { %s302_s15 = scalar_lea.vmem %s1059_s0, %s700_s12  ;;  %s702_s16 = sadd.s32 4, %s700_s12 }
  0x1a   : > { %s311_s19 = scalar_lea.vmem %s1060_s1, %s702_s16  ;;  %v313_v1 = vld [vmem:[%s302_s15] sm:$0xf]  ;;  %s292_s16 = sand.u32 1, %s868_s22  }
  0x1b   : > { %v314_v2 = vld [vmem:[%s311_s19] sm:$0xf]  ;;  %s687_s17 = sshll.u32 %s292_s16, 3  ;;  %s576_s8 = scalar_lea.sflag [#allocation3], %s292_s16 }
  0x1c   : > { %v794_v4 = vpack.i.bf16 %v314_v2, %v313_v1  ;;  %s294_s19 = scalar_lea.vmem [#allocation2], %s687_s17  ;;  %s810_s12 = sshll.u32 %s893_s24, 4  ;;  %s811_s12 = int_to_ptr.vmem [resolvable:$false] %s810_s12 }
  0x1d   : > { %s590_s20 = sshll.u32 %s294_s19, 4  ;;  %s812_s13 = scalar_lea.vmem %s811_s12, 256  ;;  %s1014_s20 = int_to_ptr.vmem [resolvable:$true] %s590_s20 }
  0x1e   : > { %795 = vrot.lane.b32.xlu0 %v794_v4, %s889_s28  ;;  %s806_s11 = scalar_lea.vmem %s1014_s20, 128  ;;  %p813_p1 = scmp.lt.s32.totalorder %s1014_s20, %s811_s12 }
  0x1f   : > { %p807_p12 = scmp.ne.s32.totalorder %s1014_s20, %s806_s11  ;;  %p814_p2 = scmp.lt.s32.totalorder %s812_s13, %s806_s11 }
  0x21   : > { %p808_p13 = pnand %p807_p12, %p969_p4  ;;  %p815_p3 = por %p814_p2, %p813_p1 }
  0x22   : > { %800 = vrot.lane.b32.xlu0 %v794_v4, %s891_s30  ;;  %s1012_s30 = scalar_lea.hbm %s1065_s6, %s697_s18 }
  0x23   : > { %p809_p0 = pneg %p808_p13 }
  0x25   : > { %p816_p5 = pnand %p815_p3, %p809_p0 }
  0x90   : > { %v796_v7 = vpop.permute.xlu0 %795 }
  0x91   : > { %v798_v8 = vunpack.i.h.bf16 %v796_v7  ;;  %v797_v9 = vunpack.i.l.bf16 %v796_v7  ;;  %v345_v19 = vpop.permute.xlu1 %344 }
  0x93   : > { %v324_v10 = vsel %vm323_vm1, %v797_v9, %v798_v8 }
  0x94   : > { %v334_v11 = vrot.slane %v324_v10, 4  ;;  %v801_v12 = vpop.permute.xlu0 %800 }
  0x95   : > { %v803_v13 = vunpack.i.h.bf16 %v801_v12  ;;  %v802_v14 = vunpack.i.l.bf16 %v801_v12 }
  0x96   : > { %v337_v15 = vsel %vm336_vm2, %v313_v1, %v334_v11 }
  0x97   : > { %v332_v16 = vsel %vm331_vm3, %v802_v14, %v803_v13 }
  0x98   : > { %v729_v17 = vpack.c.bf16 %v332_v16, %v337_v15 }
  0x9a   : > { %731 = vmatpush3.bf16.msk.msra.mxu0 %vm730_vm5, %v729_v17 }
  0x9d   : > { %716 = vmatmul.mubr.msk.f32.vlgmr.msra.gmra.mrb[0].mxu0 %vm347_vm6, %v338_v18 }
 0x170   : > { %v420_v20 = vpop.f32.mrb[0].mxu0 }
 0x171   : > { %v421_v21 = vadd.f32 %v420_v20, %v345_v19  ;;  %v717_v22 = vpop.f32.mrb[1].mxu0 }
 0x173   : > { %v424_v23 = vmax.f32 %v421_v21, 0.0 }
 0x175   : > { %719 = vmatpush3.msra.mxu1 %v424_v23 }
 0x176   : > { %721 = vmatmul.mubr.msk.f32.vlgmr.msra.gmra.mrb[0].mxu1 %vm425_vm7, %v340_v24  ;;  %723 = vmatprep.subr.mxu1 %v888_v3 }
 0x177   : > { %725 = vmatprep.mubr.msk.f32.mxu1 %vm887_vm0, %v888_v3 }
 0x249   : > { %v495_v25 = vpop.f32.mrb[0].mxu1 }
 0x24a   : > { %v499_v26 = vmax.f32 %v495_v25, 0.0  ;;  %v722_v27 = vpop.f32.mrb[1].mxu1 }
 0x24c   : > { %724 = vmatpush3.msra.mxu1 %v499_v26 }
 0x24d   : > { %726 = vmatmul.mubr.msk.f32.vlgmr.msra.gmra.mrb[2].mxu1 %vm425_vm7, %v341_v28 }
 0x320   : > { %v569_v29 = vpop.f32.mrb[2].mxu1 }
 0x321   : > { %v573_v30 = vmax.f32 %v569_v29, 0.0  ;;  %v727_v31 = vpop.f32.mrb[3].mxu1 }
 0x323   : > { %574 = vst [vmem:[%s294_s19] sm:$0xff] %v573_v30 }
 0x324   : > { %819 = shalt.err (!%p816_p5)
}
 0x325   : > { %s820_s14 = scalar_lea.hbm %s1012_s30, 128  ;;  %s824_s17 = scalar_lea.hbm %s1065_s6, 256 }
 0x326   : > { %p821_p6 = scmp.ne.s32.totalorder %s1012_s30, %s820_s14  ;;  %p825_p10 = scmp.lt.u32.totalorder %s1012_s30, %s1065_s6 }
 0x327   : > { %p826_p11 = scmp.lt.u32.totalorder %s824_s17, %s820_s14  ;;  %p828_p13 = scmp.lt.u32.totalorder %s820_s14, %s1012_s30 }
 0x328   : > { %p822_p7 = pnand %p821_p6, %p969_p4 }
 0x329   : > { %p827_p12 = por %p826_p11, %p825_p10 }
 0x32a   : > { %p823_p9 = pneg %p822_p7 }
 0x32b   : > { %p829_p0 = por %p828_p13, %p827_p12 }
 0x32d   : > { %p830_p1 = pnand %p829_p0, %p823_p9 }
 0x32f   : > { %833 = shalt.err (!%p830_p1)
}
 0x330   : > { %732 = dma.vmem_to_hbm [thread:$0]  (%p969_p4), %s1014_s20, 128, %s1012_s30, %s576_s8  }
 0x331 PF: > { %p738_p2 = scmp.ge.s32.totalorder %s884_s26, 2  ;;  %s602_s27 = sand.u32 1, %s864_s21  }
 0x332   : > { %s603_s28 = scalar_lea.sflag [#allocation3], %s602_s27 }
 0x333   : > { %p735_p3 = pnand %p738_p2, %p976_p8 }
 0x335   : > { %859 = dma.done.wait (!%p735_p3), %s603_s28, 128  }
 0x336   : > { %861 = vsyncadd (!%p735_p3), %s603_s28, 4294967168  ;;  %s19_s26 = sadd.s32 1, %s884_s26   ;;  %s1068_s21 = smov %s868_s22 }
 0x337   : > { %p16_p5 = scmp.ge.s32.totalorder %s19_s26, 4   ;;  %s1069_s22 = smov %s872_s23 }
 0x338   : > { %s1070_s23 = smov %s982_s10  ;;  %s1071_s24 = smov %s880_s25 }
 0x339   : > { %s1072_s25 = smov %s1074_s29  ;;  %18 = sbr.rel (!%p16_p5) target bundleno = 4 (0x4), region = 82 }
 0x340   :  { %608 = vsyncpa [#allocation3], 1 }
 0x341   :  { %610 = vsyncpa [#allocation3 + $0x1], 1 }

</bundles_post_ra>
